<compile_context>
chip_gen: v7x
topology: tpu7x:2x2x1
jax: 0.10.0
libtpu: 0.0.40
codegen_flags: <defaults>
</compile_context>

<pallas_src>
import functools

import jax
import jax.numpy as jnp
from jax import lax
from jax.experimental import pallas as pl
from jax.experimental.pallas import tpu as pltpu

# ---- "config" values used by the original module (classic VAE-GAN encoder) ----
KERNEL_SIZE = 5
PADDING = 2
STRIDE = 2
BN_EPS = 1e-5

LANE = 128
MAX_TK = 2048                    # K-tile cap (keeps resident slabs small on v7x)
MAX_TM2 = 2048                   # row-tile cap for the elementwise BN+ReLU kernel
VMEM_LIMIT = 32 * 1024 * 1024    # K-tiled residency is a few MB, safe everywhere


def _round_up(a, b):
    return (a + b - 1) // b * b


def _pick_tm(m_true):
    """Row tile for kernel 1: large for real layers, but >= 2 grid blocks for
    small layers so v7x's two TensorCores both get work."""
    if m_true >= 512:
        return 256
    if m_true >= 256:
        return 128
    return 64


def _pick_tk(k):
    """K tile: multiple of 128, <= MAX_TK, dividing the padded K when possible."""
    k128 = _round_up(k, LANE)
    if k128 <= MAX_TK:
        return k128, k128
    tk = LANE
    for t in range(MAX_TK, 0, -LANE):
        if k128 % t == 0:
            tk = t
            break
    return tk, _round_up(k128, tk)


def _pick_tm2(m_pad, tm):
    """Row tile for kernel 2: largest multiple of tm dividing m_pad, capped at
    MAX_TM2, keeping >= 2 grid steps when possible (megacore)."""
    cap = min(MAX_TM2, m_pad)
    if m_pad >= 2 * tm:
        cap = min(cap, m_pad // 2)
    tm2 = tm
    t = tm
    while t <= cap:
        if m_pad % t == 0:
            tm2 = t
        t += tm
    return tm2


# --------------------------- Pallas kernels -----------------------------------
def _conv_stats_kernel(p_ref, w_ref, y_ref, sum_ref, sq_ref, acc_ref,
                       *, tm, c_pad, chunk):
    """K-tiled bf16 matmul (f32 VMEM accumulator) + per-M-block BN partials.

    Grid = (grid_m, grid_k); M axis "parallel" (megacore), K axis "arbitrary".
    At the last K step the accumulator is streamed out chunk-wise: each chunk
    is stored to y_ref (bf16 when the pre-BN tensor is not returned) and
    reduced with VALU/XLU sublane sums — no MXU contention, bounded live ranges.
    """
    kk = pl.program_id(1)

    @pl.when(kk == 0)
    def _():
        acc_ref[...] = jnp.zeros_like(acc_ref)

    acc_ref[...] += jnp.dot(p_ref[...], w_ref[...],
                            preferred_element_type=jnp.float32)

    @pl.when(kk == pl.num_programs(1) - 1)
    def _():
        def body(c, carry):
            s, q = carry
            off = pl.multiple_of(c * chunk, chunk)
            yc = acc_ref[pl.ds(off, chunk), :]
            y_ref[pl.ds(off, chunk), :] = yc.astype(y_ref.dtype)
            s = s + jnp.sum(yc, axis=0, keepdims=True)
            q = q + jnp.sum(yc * yc, axis=0, keepdims=True)
            return s, q

        zeros = jnp.zeros((1, c_pad), jnp.float32)
        s, q = lax.fori_loop(0, tm // chunk, body, (zeros, zeros), unroll=True)
        sum_ref[...] = jnp.broadcast_to(s, (8, c_pad))
        sq_ref[...] = jnp.broadcast_to(q, (8, c_pad))


def _bn_relu_kernel(y_ref, scale_ref, shift_ref, o_ref):
    """Elementwise y*scale + shift followed by ReLU (scale/shift per channel)."""
    y = y_ref[...].astype(jnp.float32)
    o_ref[...] = jnp.maximum(y * scale_ref[...] + shift_ref[...], 0.0)


# ------------------------------- glue ------------------------------------------
def _im2col(x_nhwc, kh, kw, stride, pad):
    """Extract conv patches. Returns (N*Ho*Wo, kh*kw*Cin), Ho, Wo."""
    n, h, w, c = x_nhwc.shape
    xp = jnp.pad(x_nhwc, ((0, 0), (pad, pad), (pad, pad), (0, 0)))
    ho = (h + 2 * pad - kh) // stride + 1
    wo = (w + 2 * pad - kw) // stride + 1
    cols = []
    for di in range(kh):
        for dj in range(kw):
            cols.append(xp[:, di:di + stride * ho:stride, dj:dj + stride * wo:stride, :])
    patches = jnp.stack(cols, axis=3)  # (N, Ho, Wo, kh*kw, Cin)
    return patches.reshape(n * ho * wo, kh * kw * c), ho, wo


@functools.partial(jax.jit, static_argnames=("out",))
def encoder_block_forward(x_nchw, weight_oihw, gamma, beta, out=False):
    """Forward of EncoderBlock. x_nchw: (N, Cin, H, W) float32."""
    n, cin, h, w = x_nchw.shape
    cout = weight_oihw.shape[0]

    # --- layout + im2col glue; cast to bf16 BEFORE im2col so the materialized
    #     patches intermediate moves half the HBM bytes ---
    x_nhwc = jnp.transpose(x_nchw, (0, 2, 3, 1)).astype(jnp.bfloat16)
    patches, ho, wo = _im2col(x_nhwc, KERNEL_SIZE, KERNEL_SIZE, STRIDE, PADDING)
    m_true, k = patches.shape

    tm = _pick_tm(m_true)
    tk, k_pad = _pick_tk(k)
    c_align = 256 if cout >= 256 else LANE     # match 2x256^2 MXU when compute-bound
    c_pad = _round_up(cout, c_align)
    m_pad = _round_up(m_true, tm)
    grid_m = m_pad // tm
    grid_k = k_pad // tk
    chunk = min(128, tm)                       # stats/store sub-chunk rows

    # zero-padded rows/cols contribute nothing to the conv or the statistics.
    patches = jnp.pad(patches, ((0, m_pad - m_true), (0, k_pad - k)))

    # weight (Cout, Cin, KH, KW) -> (KH, KW, Cin, Cout) -> (K, Cout) matching patch order
    w_mat = jnp.transpose(weight_oihw, (2, 3, 1, 0)).reshape(k, cout)
    w_mat = jnp.pad(w_mat, ((0, k_pad - k), (0, c_pad - cout))).astype(jnp.bfloat16)

    # conv output dtype: bf16 round-trip when the pre-BN tensor is NOT returned
    # (BN stats come from the f32 accumulator, so they are unaffected).
    y_dtype = jnp.float32 if out else jnp.bfloat16

    # --- Pallas kernel 1: K-tiled conv-as-matmul + per-block BN partial stats ---
    kernel1 = functools.partial(_conv_stats_kernel, tm=tm, c_pad=c_pad, chunk=chunk)
    y_conv, part_sum, part_sq = pl.pallas_call(
        kernel1,
        out_shape=(
            jax.ShapeDtypeStruct((m_pad, c_pad), y_dtype),
            jax.ShapeDtypeStruct((grid_m * 8, c_pad), jnp.float32),
            jax.ShapeDtypeStruct((grid_m * 8, c_pad), jnp.float32),
        ),
        grid_spec=pltpu.PrefetchScalarGridSpec(
            num_scalar_prefetch=0,
            grid=(grid_m, grid_k),
            in_specs=[
                pl.BlockSpec((tm, tk), lambda i, kk: (i, kk)),
                pl.BlockSpec((tk, c_pad), lambda i, kk: (kk, 0)),
            ],
            out_specs=(
                pl.BlockSpec((tm, c_pad), lambda i, kk: (i, 0)),
                pl.BlockSpec((8, c_pad), lambda i, kk: (i, 0)),
                pl.BlockSpec((8, c_pad), lambda i, kk: (i, 0)),
            ),
            scratch_shapes=[pltpu.VMEM((tm, c_pad), jnp.float32)],
        ),
        compiler_params=pltpu.CompilerParams(
            dimension_semantics=("parallel", "arbitrary"),   # M megacore, K reduction
            vmem_limit_bytes=VMEM_LIMIT,
        ),
    )(patches, w_mat)

    # --- per-channel scalar glue: reduce partials, mean/var -> affine scale/shift ---
    ch_sum = part_sum.reshape(grid_m, 8, c_pad)[:, 0, :].sum(axis=0)   # (c_pad,)
    ch_sq = part_sq.reshape(grid_m, 8, c_pad)[:, 0, :].sum(axis=0)     # (c_pad,)
    mean = ch_sum / jnp.float32(m_true)
    var = jnp.maximum(ch_sq / jnp.float32(m_true) - mean * mean, 0.0)  # biased (training BN)
    inv_std = lax.rsqrt(var + BN_EPS)

    # NOTE: padded channels rely on gamma/beta being zero-padded (scale/shift
    # become exactly 0 there); padded lanes are sliced off below.
    gamma_p = jnp.pad(gamma.astype(jnp.float32), (0, c_pad - cout))
    beta_p = jnp.pad(beta.astype(jnp.float32), (0, c_pad - cout))
    scale = (gamma_p * inv_std).reshape(1, c_pad)                      # (1, c_pad)
    shift = (beta_p - mean * gamma_p * inv_std).reshape(1, c_pad)      # (1, c_pad)

    # --- Pallas kernel 2: normalize + ReLU (big lane-dense row tiles, mem-bound) ---
    tm2 = _pick_tm2(m_pad, tm)
    y_act = pl.pallas_call(
        _bn_relu_kernel,
        out_shape=jax.ShapeDtypeStruct((m_pad, c_pad), jnp.float32),
        grid_spec=pltpu.PrefetchScalarGridSpec(
            num_scalar_prefetch=0,
            grid=(m_pad // tm2,),
            in_specs=[
                pl.BlockSpec((tm2, c_pad), lambda i: (i, 0)),
                pl.BlockSpec((1, c_pad), lambda i: (0, 0)),
                pl.BlockSpec((1, c_pad), lambda i: (0, 0)),
            ],
            out_specs=pl.BlockSpec((tm2, c_pad), lambda i: (i, 0)),
        ),
        compiler_params=pltpu.CompilerParams(
            dimension_semantics=("parallel",),
            vmem_limit_bytes=VMEM_LIMIT,
        ),
    )(y_conv, scale, shift)

    # --- back to NCHW (slice off row/channel padding) ---
    def to_nchw(flat):
        return jnp.transpose(
            flat[:m_true, :cout].astype(jnp.float32).reshape(n, ho, wo, cout),
            (0, 3, 1, 2))

    ten = to_nchw(y_act)
    if out:
        return ten, to_nchw(y_conv)   # pre-BN conv output, as in the `out=True` branch
    return ten


# ------------------------------ reference ---------------------------------------
def _reference(x_nchw, weight_oihw, gamma, beta):
    y = jax.lax.conv_general_dilated(
        x_nchw, weight_oihw, window_strides=(STRIDE, STRIDE),
        padding=[(PADDING, PADDING), (PADDING, PADDING)],
        dimension_numbers=("NCHW", "OIHW", "NCHW"))
    mean = y.mean(axis=(0, 2, 3), keepdims=True)
    var = y.var(axis=(0, 2, 3), keepdims=True)  # biased
    yn = (y - mean) * lax.rsqrt(var + BN_EPS)
    yn = yn * gamma.reshape(1, -1, 1, 1) + beta.reshape(1, -1, 1, 1)
    return jnp.maximum(yn, 0.0)


# -------------------------------- main -------------------------------------------
if __name__ == "__main__":
    channel_in, channel_out = 4, 8
    N, H, W = 2, 16, 16

    key = jax.random.PRNGKey(0)
    kx, kw, kg, kb = jax.random.split(key, 4)
    x = jax.random.normal(kx, (N, channel_in, H, W), dtype=jnp.float32)
    weight = 0.1 * jax.random.normal(
        kw, (channel_out, channel_in, KERNEL_SIZE, KERNEL_SIZE), dtype=jnp.float32)
    gamma = 1.0 + 0.1 * jax.random.normal(kg, (channel_out,), dtype=jnp.float32)
    beta = 0.1 * jax.random.normal(kb, (channel_out,), dtype=jnp.float32)

    y = encoder_block_forward(x, weight, gamma, beta, out=False)
    y = jax.block_until_ready(y)

    y_ref = _reference(x, weight, gamma, beta)
    assert y.shape == y_ref.shape == (N, channel_out, H // STRIDE, W // STRIDE)
    max_err = float(jnp.max(jnp.abs(y - y_ref)))
    # bf16 matmul inputs (f32 accumulation) trade ~1e-2 absolute error post-BN
    # for 2-4x MXU throughput and half the patch HBM read traffic.
    assert jnp.allclose(y, y_ref, atol=3e-2, rtol=3e-2), max_err

    # exercise the out=True branch (also returns the pre-BN conv output, f32)
    y2, y_pre = encoder_block_forward(x, weight, gamma, beta, out=True)
    jax.block_until_ready((y2, y_pre))
    assert y_pre.shape == y_ref.shape

    print("KERNEL_OK")
</pallas_src>

<mosaic_0001>
module attributes {stable_mosaic.version = 11 : i64} {
  func.func @_conv_stats_kernel(%arg0: i32, %arg1: i32, %arg2: memref<64x128xbf16, #tpu.memory_space<vmem>>, %arg3: memref<128x128xbf16, #tpu.memory_space<vmem>>, %arg4: memref<64x128xbf16, #tpu.memory_space<vmem>>, %arg5: memref<8x128xf32, #tpu.memory_space<vmem>>, %arg6: memref<8x128xf32, #tpu.memory_space<vmem>>, %arg7: memref<64x128xf32, #tpu.memory_space<vmem>>) attributes {dimension_semantics = [#tpu.dimension_semantics<parallel>, #tpu.dimension_semantics<arbitrary>], iteration_bounds = array<i64: 2, 1>, scalar_prefetch = 0 : i64, scratch_operands = 1 : i64, tpu.core_type = #tpu.core_type<tc>, window_params = [{transform_indices = @transform_0, window_bounds = array<i64: 64, 128>}, {transform_indices = @transform_1, window_bounds = array<i64: 128, 128>}, {transform_indices = @transform_2, window_bounds = array<i64: 64, 128>}, {transform_indices = @transform_3, window_bounds = array<i64: 8, 128>}, {transform_indices = @transform_4, window_bounds = array<i64: 8, 128>}]} {
    %c0_i32 = arith.constant 0 : i32
    %0 = arith.cmpi eq, %arg1, %c0_i32 : i32
    %1 = arith.extui %0 : i1 to i32
    %c0_i32_0 = arith.constant 0 : i32
    %2 = arith.cmpi ne, %1, %c0_i32_0 : i32
    scf.if %2 {
      %cst_10 = arith.constant 0.000000e+00 : f32
      %12 = vector.broadcast %cst_10 : f32 to vector<64x128xf32>
      %c0_11 = arith.constant 0 : index
      %c0_12 = arith.constant 0 : index
      %13 = vector.load %arg7[%c0_11, %c0_12] : memref<64x128xf32, #tpu.memory_space<vmem>>, vector<64x128xf32>
      tpu.vector_store %arg7[%c0_11, %c0_12], %12 {strides = array<i32>} : memref<64x128xf32, #tpu.memory_space<vmem>>, vector<64x128xf32>,
    } else {
    }
    %c0 = arith.constant 0 : index
    %c0_1 = arith.constant 0 : index
    %3 = vector.load %arg7[%c0, %c0_1] : memref<64x128xf32, #tpu.memory_space<vmem>>, vector<64x128xf32>
    %c0_2 = arith.constant 0 : index
    %c0_3 = arith.constant 0 : index
    %4 = vector.load %arg2[%c0_2, %c0_3] : memref<64x128xbf16, #tpu.memory_space<vmem>>, vector<64x128xbf16>
    %c0_4 = arith.constant 0 : index
    %c0_5 = arith.constant 0 : index
    %5 = vector.load %arg3[%c0_4, %c0_5] : memref<128x128xbf16, #tpu.memory_space<vmem>>, vector<128x128xbf16>
    %cst = arith.constant dense<0.000000e+00> : vector<64x128xf32>
    %6 = tpu.matmul %4, %5, %cst {dimension_numbers = #tpu.dot_dimension_numbers<[1], [0], [0], [1], [0, 0, 1, 1], [], []>} : vector<64x128xbf16>, vector<128x128xbf16>, vector<64x128xf32> -> vector<64x128xf32>
    %7 = arith.addf %3, %6 : vector<64x128xf32>
    %c0_6 = arith.constant 0 : index
    %c0_7 = arith.constant 0 : index
    %8 = vector.load %arg7[%c0_6, %c0_7] : memref<64x128xf32, #tpu.memory_space<vmem>>, vector<64x128xf32>
    tpu.vector_store %arg7[%c0_6, %c0_7], %7 {strides = array<i32>} : memref<64x128xf32, #tpu.memory_space<vmem>>, vector<64x128xf32>,
    %c0_i32_8 = arith.constant 0 : i32
    %9 = arith.cmpi eq, %arg1, %c0_i32_8 : i32
    %10 = arith.extui %9 : i1 to i32
    %c0_i32_9 = arith.constant 0 : i32
    %11 = arith.cmpi ne, %10, %c0_i32_9 : i32
    scf.if %11 {
      %cst_10 = arith.constant 0.000000e+00 : f32
      %12 = vector.broadcast %cst_10 : f32 to vector<1x128xf32>
      %c0_i32_11 = arith.constant 0 : i32
      %c64_i32 = arith.constant 64 : i32
      %13 = arith.muli %c0_i32_11, %c64_i32 : i32
      %14 = tpu.assume_multiple %13, 64 : i32
      %15 = arith.index_cast %14 : i32 to index
      %c0_12 = arith.constant 0 : index
      %16 = vector.load %arg7[%15, %c0_12] : memref<64x128xf32, #tpu.memory_space<vmem>>, vector<64x128xf32>
      %17 = arith.truncf %16 : vector<64x128xf32> to vector<64x128xbf16>
      %18 = arith.index_cast %14 : i32 to index
      %c0_13 = arith.constant 0 : index
      %19 = vector.load %arg4[%18, %c0_13] : memref<64x128xbf16, #tpu.memory_space<vmem>>, vector<64x128xbf16>
      tpu.vector_store %arg4[%18, %c0_13], %17 {strides = array<i32>} : memref<64x128xbf16, #tpu.memory_space<vmem>>, vector<64x128xbf16>,
      %cst_14 = arith.constant dense<0.000000e+00> : vector<128xf32>
      %20 = vector.multi_reduction <add>, %16, %cst_14 [0] : vector<64x128xf32> to vector<128xf32>
      %21 = vector.shape_cast %20 : vector<128xf32> to vector<1x128xf32>
      %22 = arith.addf %12, %21 : vector<1x128xf32>
      %23 = arith.mulf %16, %16 : vector<64x128xf32>
      %cst_15 = arith.constant dense<0.000000e+00> : vector<128xf32>
      %24 = vector.multi_reduction <add>, %23, %cst_15 [0] : vector<64x128xf32> to vector<128xf32>
      %25 = vector.shape_cast %24 : vector<128xf32> to vector<1x128xf32>
      %26 = arith.addf %12, %25 : vector<1x128xf32>
      %c1_i32 = arith.constant 1 : i32
      %27 = vector.shape_cast %22 : vector<1x128xf32> to vector<1x128xf32>
      %28 = vector.broadcast %27 : vector<1x128xf32> to vector<8x128xf32>
      %c0_16 = arith.constant 0 : index
      %c0_17 = arith.constant 0 : index
      %29 = vector.load %arg5[%c0_16, %c0_17] : memref<8x128xf32, #tpu.memory_space<vmem>>, vector<8x128xf32>
      tpu.vector_store %arg5[%c0_16, %c0_17], %28 {strides = array<i32>} : memref<8x128xf32, #tpu.memory_space<vmem>>, vector<8x128xf32>,
      %30 = vector.shape_cast %26 : vector<1x128xf32> to vector<1x128xf32>
      %31 = vector.broadcast %30 : vector<1x128xf32> to vector<8x128xf32>
      %c0_18 = arith.constant 0 : index
      %c0_19 = arith.constant 0 : index
      %32 = vector.load %arg6[%c0_18, %c0_19] : memref<8x128xf32, #tpu.memory_space<vmem>>, vector<8x128xf32>
      tpu.vector_store %arg6[%c0_18, %c0_19], %31 {strides = array<i32>} : memref<8x128xf32, #tpu.memory_space<vmem>>, vector<8x128xf32>,
    } else {
    }
    return
  }
  func.func @transform_0(%arg0: i32, %arg1: i32) -> (i32, i32) {
    %c0_i32 = arith.constant 0 : i32
    return %arg0, %arg1 : i32, i32
  }
  func.func @transform_1(%arg0: i32, %arg1: i32) -> (i32, i32) {
    %c0_i32 = arith.constant 0 : i32
    %c0_i32_0 = arith.constant 0 : i32
    return %arg1, %c0_i32 : i32, i32
  }
  func.func @transform_2(%arg0: i32, %arg1: i32) -> (i32, i32) {
    %c0_i32 = arith.constant 0 : i32
    %c0_i32_0 = arith.constant 0 : i32
    return %arg0, %c0_i32 : i32, i32
  }
  func.func @transform_3(%arg0: i32, %arg1: i32) -> (i32, i32) {
    %c0_i32 = arith.constant 0 : i32
    %c0_i32_0 = arith.constant 0 : i32
    return %arg0, %c0_i32 : i32, i32
  }
  func.func @transform_4(%arg0: i32, %arg1: i32) -> (i32, i32) {
    %c0_i32 = arith.constant 0 : i32
    %c0_i32_0 = arith.constant 0 : i32
    return %arg0, %c0_i32 : i32, i32
  }
}

module attributes {stable_mosaic.version = 11 : i64} {
  func.func @_bn_relu_kernel(%arg0: i32, %arg1: memref<64x128xbf16, #tpu.memory_space<vmem>>, %arg2: memref<1x128xf32, #tpu.memory_space<vmem>>, %arg3: memref<1x128xf32, #tpu.memory_space<vmem>>, %arg4: memref<64x128xf32, #tpu.memory_space<vmem>>) attributes {dimension_semantics = [#tpu.dimension_semantics<parallel>], iteration_bounds = array<i64: 2>, scalar_prefetch = 0 : i64, scratch_operands = 0 : i64, tpu.core_type = #tpu.core_type<tc>, window_params = [{transform_indices = @transform_0, window_bounds = array<i64: 64, 128>}, {pipeline_mode = #tpu.pipeline_mode<synchronous>, transform_indices = @transform_1, window_bounds = array<i64: 1, 128>}, {pipeline_mode = #tpu.pipeline_mode<synchronous>, transform_indices = @transform_2, window_bounds = array<i64: 1, 128>}, {transform_indices = @transform_3, window_bounds = array<i64: 64, 128>}]} {
    %c0 = arith.constant 0 : index
    %c0_0 = arith.constant 0 : index
    %0 = vector.load %arg1[%c0, %c0_0] : memref<64x128xbf16, #tpu.memory_space<vmem>>, vector<64x128xbf16>
    %1 = arith.extf %0 : vector<64x128xbf16> to vector<64x128xf32>
    %c0_1 = arith.constant 0 : index
    %c0_2 = arith.constant 0 : index
    %2 = vector.load %arg2[%c0_1, %c0_2] : memref<1x128xf32, #tpu.memory_space<vmem>>, vector<1x128xf32>
    %3 = vector.broadcast %2 : vector<1x128xf32> to vector<64x128xf32>
    %4 = arith.mulf %1, %3 : vector<64x128xf32>
    %c0_3 = arith.constant 0 : index
    %c0_4 = arith.constant 0 : index
    %5 = vector.load %arg3[%c0_3, %c0_4] : memref<1x128xf32, #tpu.memory_space<vmem>>, vector<1x128xf32>
    %6 = vector.broadcast %5 : vector<1x128xf32> to vector<64x128xf32>
    %7 = arith.addf %4, %6 : vector<64x128xf32>
    %cst = arith.constant 0.000000e+00 : f32
    %8 = vector.broadcast %cst : f32 to vector<64x128xf32>
    %9 = arith.maximumf %7, %8 : vector<64x128xf32>
    %c0_5 = arith.constant 0 : index
    %c0_6 = arith.constant 0 : index
    %10 = vector.load %arg4[%c0_5, %c0_6] : memref<64x128xf32, #tpu.memory_space<vmem>>, vector<64x128xf32>
    tpu.vector_store %arg4[%c0_5, %c0_6], %9 {strides = array<i32>} : memref<64x128xf32, #tpu.memory_space<vmem>>, vector<64x128xf32>,
    return
  }
  func.func @transform_0(%arg0: i32) -> (i32, i32) {
    %c0_i32 = arith.constant 0 : i32
    %c0_i32_0 = arith.constant 0 : i32
    return %arg0, %c0_i32 : i32, i32
  }
  func.func @transform_1(%arg0: i32) -> (i32, i32) {
    %c0_i32 = arith.constant 0 : i32
    %c0_i32_0 = arith.constant 0 : i32
    %c0_i32_1 = arith.constant 0 : i32
    return %c0_i32, %c0_i32_0 : i32, i32
  }
  func.func @transform_2(%arg0: i32) -> (i32, i32) {
    %c0_i32 = arith.constant 0 : i32
    %c0_i32_0 = arith.constant 0 : i32
    %c0_i32_1 = arith.constant 0 : i32
    return %c0_i32, %c0_i32_0 : i32, i32
  }
  func.func @transform_3(%arg0: i32) -> (i32, i32) {
    %c0_i32 = arith.constant 0 : i32
    %c0_i32_0 = arith.constant 0 : i32
    return %arg0, %c0_i32 : i32, i32
  }
}

</mosaic_0001>

<bundles_post_ra>
// kernel: encoder_block_forward.3
= control target key start
LH: loop header
LB: loop body
LE: loop exit
PB: predicated region body
PF: predicated region fallthrough
CT: control target
= control target key end

     0   :  { %s360_s12 = smov 0   ;;  %s387_s0 = inlined_call_operand.vmem [shape: bf16[128,128], index: 0, kind: input, shape index: {}]   ;;  %s388_s1 = inlined_call_operand.vmem [shape: f32[1,128], index: 1, kind: input, shape index: {}]   ;;  %s389_s2 = inlined_call_operand.vmem [shape: f32[1,128], index: 2, kind: input, shape index: {}]   ;;  %s390_s3 = inlined_call_operand.vmem [shape: f32[128,128], index: 3, kind: output, shape index: {}]  }
   0x1 LB: > { %s292_s13 = sadd.s32 4294967295, %s338_s12   ;;  %p296_p0 = scmp.ge.s32.totalorder %s338_s12, 1  ;;  %s338_s12 = sphi %s360_s12, %s13_s12  }
   0x2   : > { %p138_p1 = scmp.lt.s32.totalorder %s338_s12, 3 }
   0x4   : > { %p139_p2 = pnand %p296_p0, %p138_p1 }
   0x5   : > { %s297_s14 = sshll.u32 (!%p139_p2), %s292_s13, 3  ;;  %v301_v0 = vld [vmem:[%s388_s1] ss:$0 sm:$0xff] (!%p139_p2) }
   0x6   : > { %142 = sbr.rel (%p139_p2) target bundleno = 29 (0x1d), region = 32  ;;  %p163_p3 = scmp.lt.s32.totalorder (!%p139_p2), %s297_s14, 15  ;;  %v302_v9 = vld [vmem:[%s389_s2] ss:$0 sm:$0xff] (!%p139_p2) }
   0xd   : > { %s392_s14 = smov (!%p163_p3, %s297_s14), 15 }
   0xe   : > { %s298_s15 = sshll.u32 %s392_s14, 2  ;;  %s300_s23 = sshll.u32 %s392_s14, 3 }
   0xf   : > { %s166_s18 = scalar_lea.vmem %s387_s0, %s298_s15  ;;  %s172_s26 = scalar_lea.vmem %s390_s3, %s300_s23 }
  0x10   : > { %v306_v1 = vld [vmem:[%s166_s18] sm:$0xff]   ;;  %v321_v2 = vld [vmem:[%s166_s18 + $0x8] sm:$0xff]   ;;  %v322_v3 = vld [vmem:[%s166_s18 + $0x10] sm:$0xff]  }
  0x11   : > { %v307_v4 = vunpack.c.l.bf16 %v306_v1  ;;  %v308_v5 = vunpack.c.h.bf16 %v306_v1  ;;  %v311_v6 = vunpack.c.l.bf16 %v321_v2  ;;  %v312_v7 = vunpack.c.h.bf16 %v321_v2  ;;  %v323_v8 = vld [vmem:[%s166_s18 + $0x18] sm:$0xff]  }
  0x12   : > { %v315_v10 = vunpack.c.l.bf16 %v322_v3  ;;  %v316_v11 = vunpack.c.h.bf16 %v322_v3  ;;  %v319_v12 = vunpack.c.l.bf16 %v323_v8  ;;  %v320_v13 = vunpack.c.h.bf16 %v323_v8 }
  0x13   : > { %v197_v14 = vmul.f32 %v307_v4, %v301_v0  ;;  %v198_v15 = vmul.f32 %v308_v5, %v301_v0  ;;  %v199_v16 = vmul.f32 %v311_v6, %v301_v0  ;;  %v200_v17 = vmul.f32 %v312_v7, %v301_v0 }
  0x14   : > { %v201_v18 = vmul.f32 %v315_v10, %v301_v0  ;;  %v202_v19 = vmul.f32 %v316_v11, %v301_v0  ;;  %v203_v20 = vmul.f32 %v319_v12, %v301_v0  ;;  %v204_v21 = vmul.f32 %v320_v13, %v301_v0 }
  0x15   : > { %v212_v22 = vadd.f32 %v302_v9, %v197_v14  ;;  %v213_v23 = vadd.f32 %v302_v9, %v198_v15  ;;  %v214_v24 = vadd.f32 %v302_v9, %v199_v16  ;;  %v215_v25 = vadd.f32 %v302_v9, %v200_v17 }
  0x16   : > { %v216_v26 = vadd.f32 %v302_v9, %v201_v18  ;;  %v217_v27 = vadd.f32 %v302_v9, %v202_v19  ;;  %v218_v28 = vadd.f32 %v302_v9, %v203_v20  ;;  %v219_v29 = vadd.f32 %v302_v9, %v204_v21 }
  0x17   : > { %v220_v30 = vmax.f32 %v212_v22, 0.0  ;;  %v221_v31 = vmax.f32 %v213_v23, 0.0  ;;  %v222_v32 = vmax.f32 %v214_v24, 0.0  ;;  %v223_v33 = vmax.f32 %v215_v25, 0.0 }
  0x18   : > { %v224_v34 = vmax.f32 %v216_v26, 0.0  ;;  %v225_v35 = vmax.f32 %v217_v27, 0.0  ;;  %v226_v36 = vmax.f32 %v218_v28, 0.0  ;;  %v227_v37 = vmax.f32 %v219_v29, 0.0 }
  0x19   : > { %228 = vst [vmem:[%s172_s26] sm:$0xff] %v220_v30  ;;  %229 = vst [vmem:[%s172_s26 + $0x8] sm:$0xff] %v221_v31 }
  0x1a   : > { %230 = vst [vmem:[%s172_s26 + $0x10] sm:$0xff] %v222_v32  ;;  %231 = vst [vmem:[%s172_s26 + $0x18] sm:$0xff] %v223_v33 }
  0x1b   : > { %232 = vst [vmem:[%s172_s26 + $0x20] sm:$0xff] %v224_v34  ;;  %233 = vst [vmem:[%s172_s26 + $0x28] sm:$0xff] %v225_v35 }
  0x1c   : > { %234 = vst [vmem:[%s172_s26 + $0x30] sm:$0xff] %v226_v36  ;;  %235 = vst [vmem:[%s172_s26 + $0x38] sm:$0xff] %v227_v37 }
  0x1d PF: > { %s13_s12 = sadd.s32 1, %s338_s12  }
  0x1e   : > { %p10_p4 = scmp.ge.s32.totalorder %s13_s12, 4  }
  0x20   :  { %12 = sbr.rel (!%p10_p4) target bundleno = 1 (0x1), region = 62 }

// kernel: encoder_block_forward.2
= control target key start
LH: loop header
LB: loop body
LE: loop exit
PB: predicated region body
PF: predicated region fallthrough
CT: control target
= control target key end

     0   :  { %s901_s15 = smov 0   ;;  %s903_s16 = smov 0   ;;  %s982_s0 = inlined_call_operand.vmem [shape: bf16[128,128], index: 0, kind: input, shape index: {}]   ;;  %s983_s1 = inlined_call_operand.vmem [shape: bf16[128,128], index: 1, kind: input, shape index: {}]   ;;  %s984_s2 = inlined_call_operand.vmem [shape: bf16[128,128], index: 2, kind: output, shape index: {0}]   ;;  %s985_s3 = inlined_call_operand.vmem [shape: f32[16,128], index: 3, kind: output, shape index: {1}]   ;;  %s986_s4 = inlined_call_operand.vmem [shape: f32[16,128], index: 4, kind: output, shape index: {2}]  }
   0x1   :  { %s905_s17 = smov 0  }
   0x2 LB: > { %s27_s18 = sadd.s32 1, %s870_s16  ;;  %p704_p0 = scmp.ge.s32.totalorder %s874_s17, 1  ;;  %s874_s17 = sphi %s905_s17, %s15_s17   ;;  %s870_s16 = sphi %s903_s16, %s988_s16   ;;  %s866_s15 = sphi %s901_s15, %s987_s15  }
   0x3   : > { %p29_p1 = scmp.ge.s32.totalorder %s27_s18, 2  ;;  %p196_p2 = scmp.lt.s32.totalorder %s874_s17, 3 }
   0x5   : > { %s990_s18 = smov (%p29_p1, %s27_s18), 0  ;;  %p197_p3 = pnand %p704_p0, %p196_p2 }
   0x6   : > { %v840_v0 = vld [vmem:[%s983_s1] sm:$0xff] (!%p197_p3)   ;;  %s705_s21 = sshll.u32 (!%p197_p3), %s866_s15, 3  ;;  %v841_v1 = vld [vmem:[%s983_s1 + $0x8] sm:$0xff] (!%p197_p3)   ;;  %v842_v2 = vld [vmem:[%s983_s1 + $0x10] sm:$0xff] (!%p197_p3)   ;;  %p259_p5 = scmp.lt.s32.totalorder (!%p197_p3), %s866_s15, 1 }
   0x7   : > { %200 = sbr.rel (%p197_p3) target bundleno = 283 (0x11b), region = 28  ;;  %p239_p4 = scmp.lt.s32.totalorder (!%p197_p3), %s705_s21, 15  ;;  %776 = vmatprep.subr.bf16.mxu0 (!%p197_p3), %v840_v0  ;;  %800 = vmatprep.subr.bf16.mxu1 (!%p197_p3), %v840_v0  ;;  %v843_v3 = vld [vmem:[%s983_s1 + $0x18] sm:$0xff] (!%p197_p3)   ;;  %v844_v6 = vld [vmem:[%s983_s1 + $0x20] sm:$0xff] (!%p197_p3)   ;;  %v845_v7 = vld [vmem:[%s983_s1 + $0x28] sm:$0xff] (!%p197_p3)  }
   0x8   : > { %777 = vmatpush3.bf16.msra.mxu0 (!%p197_p3), %v840_v0  ;;  %808 = vmatpush3.bf16.msra.mxu1 (!%p197_p3), %v840_v0  ;;  %v846_v8 = vld [vmem:[%s983_s1 + $0x30] sm:$0xff] (!%p197_p3)   ;;  %v847_v9 = vld [vmem:[%s983_s1 + $0x38] sm:$0xff] (!%p197_p3)  }
   0x9   : > { %778 = vmatprep.subr.bf16.mxu0 (!%p197_p3), %v841_v1  ;;  %801 = vmatprep.subr.bf16.mxu1 (!%p197_p3), %v841_v1 }
   0xc   : > { %779 = vmatpush3.bf16.msra.mxu0 (!%p197_p3), %v841_v1  ;;  %809 = vmatpush3.bf16.msra.mxu1 (!%p197_p3), %v841_v1 }
   0xd   : > { %780 = vmatprep.subr.bf16.mxu0 (!%p197_p3), %v842_v2  ;;  %802 = vmatprep.subr.bf16.mxu1 (!%p197_p3), %v842_v2 }
   0xe   : > { %s992_s21 = smov (!%p239_p4, %s705_s21), 15  ;;  %s994_s15 = smov (!%p259_p5, %s866_s15), 1 }
   0xf   : > { %s706_s26 = sshll.u32 %s992_s21, 2  ;;  %s709_s21 = sshll.u32 %s994_s15, 3 }
  0x10   : > { %s939_s29 = scalar_lea.vmem %s982_s0, %s706_s26  ;;  %781 = vmatpush3.bf16.msra.mxu0 %v842_v2  ;;  %810 = vmatpush3.bf16.msra.mxu1 %v842_v2  ;;  %s257_s20 = scalar_lea.vmem %s984_s2, %s706_s26 }
  0x11   : > { %v848_v4 = vld [vmem:[%s939_s29] sm:$0xff]   ;;  %v850_v5 = vld [vmem:[%s939_s29 + $0x10] sm:$0xff]   ;;  %782 = vmatprep.subr.bf16.mxu0 %v843_v3  ;;  %803 = vmatprep.subr.bf16.mxu1 %v843_v3  ;;  %v849_v10 = vld [vmem:[%s939_s29 + $0x8] sm:$0xff]   ;;  %s262_s24 = scalar_lea.vmem %s985_s3, %s709_s21  ;;  %s266_s27 = scalar_lea.vmem %s986_s4, %s709_s21 }
  0x12   : > { %792 = vmatprep.mubr.bf16.mxu0 %v848_v4  ;;  %796 = vmatprep.mubr.bf16.mxu1 %v850_v5  ;;  %v851_v11 = vld [vmem:[%s939_s29 + $0x18] sm:$0xff]  }
  0x14   : > { %783 = vmatpush3.bf16.msra.mxu0 %v843_v3  ;;  %811 = vmatpush3.bf16.msra.mxu1 %v843_v3 }
  0x15   : > { %784 = vmatprep.subr.bf16.mxu0 %v844_v6  ;;  %804 = vmatprep.subr.bf16.mxu1 %v844_v6 }
  0x18   : > { %785 = vmatpush3.bf16.msra.mxu0 %v844_v6  ;;  %812 = vmatpush3.bf16.msra.mxu1 %v844_v6 }
  0x19   : > { %786 = vmatprep.subr.bf16.mxu0 %v845_v7  ;;  %805 = vmatprep.subr.bf16.mxu1 %v845_v7 }
  0x1c   : > { %787 = vmatpush3.bf16.msra.mxu0 %v845_v7  ;;  %813 = vmatpush3.bf16.msra.mxu1 %v845_v7 }
  0x1d   : > { %788 = vmatprep.subr.bf16.mxu0 %v846_v8  ;;  %806 = vmatprep.subr.bf16.mxu1 %v846_v8 }
  0x20   : > { %789 = vmatpush3.bf16.msra.mxu0 %v846_v8  ;;  %814 = vmatpush3.bf16.msra.mxu1 %v846_v8 }
  0x21   : > { %790 = vmatprep.subr.bf16.mxu0 %v847_v9  ;;  %807 = vmatprep.subr.bf16.mxu1 %v847_v9 }
  0x24   : > { %791 = vmatpush3.bf16.msra.mxu0 %v847_v9  ;;  %815 = vmatpush3.bf16.msra.mxu1 %v847_v9 }
  0x27   : > { %793 = vmatmul.mubr.bf16.vlgmr.msra.gmra.mrb[0].mxu0 %v849_v10  ;;  %797 = vmatmul.mubr.bf16.vlgmr.msra.gmra.mrb[0].mxu1 %v851_v11 }
  0xfa   : > { %v794_v12 = vpop.f32.mrb[0].mxu0  ;;  %v798_v13 = vpop.f32.mrb[0].mxu1 }
  0xfb   : > { %v418_v14 = vpop.f32.mrb[1].mxu0  ;;  %v434_v15 = vpop.f32.mrb[1].mxu1  ;;  %v532_v27 = vmul.f32 %v794_v12, %v794_v12  ;;  %v536_v39 = vmul.f32 %v798_v13, %v798_v13 }
  0xfc   : > { %v795_v16 = vpop.f32.mrb[2].mxu0  ;;  %v799_v17 = vpop.f32.mrb[2].mxu1  ;;  %v530_v18 = vmul.f32 %v418_v14, %v418_v14  ;;  %v534_v33 = vmul.f32 %v434_v15, %v434_v15 }
  0xfd   : > { %v749_v19 = vpack.c.bf16 %v795_v16, %v794_v12  ;;  %v421_v20 = vpop.f32.mrb[3].mxu0  ;;  %v759_v21 = vpack.c.bf16 %v799_v17, %v798_v13  ;;  %v437_v22 = vpop.f32.mrb[3].mxu1  ;;  %v533_v30 = vmul.f32 %v795_v16, %v795_v16  ;;  %v537_v42 = vmul.f32 %v799_v17, %v799_v17 }
  0xfe   : > { %v744_v23 = vpack.c.bf16 %v421_v20, %v418_v14  ;;  %v516_v24 = vadd.f32 %v421_v20, %v418_v14  ;;  %v531_v25 = vmul.f32 %v421_v20, %v421_v20  ;;  %v754_v26 = vpack.c.bf16 %v437_v22, %v434_v15 }
  0xff   : > { %761 = vst [vmem:[%s257_s20 + $0x8] sm:$0xff] %v749_v19   ;;  %763 = vst [vmem:[%s257_s20 + $0x18] sm:$0xff] %v759_v21   ;;  %v535_v38 = vmul.f32 %v437_v22, %v437_v22 }
 0x100   : > { %745 = vst [vmem:[%s257_s20] sm:$0xff] %v744_v23   ;;  %v517_v28 = vadd.f32 %v794_v12, %v516_v24  ;;  %v538_v29 = vadd.f32 %v531_v25, %v530_v18  ;;  %762 = vst [vmem:[%s257_s20 + $0x10] sm:$0xff] %v754_v26  }
 0x102   : > { %v539_v31 = vadd.f32 %v538_v29, %v532_v27  ;;  %v518_v32 = vadd.f32 %v795_v16, %v517_v28 }
 0x104   : > { %v519_v34 = vadd.f32 %v518_v32, %v434_v15  ;;  %v540_v35 = vadd.f32 %v539_v31, %v533_v30 }
 0x106   : > { %v541_v36 = vadd.f32 %v540_v35, %v534_v33  ;;  %v520_v37 = vadd.f32 %v519_v34, %v437_v22 }
 0x108   : > { %v521_v40 = vadd.f32 %v798_v13, %v520_v37  ;;  %v542_v41 = vadd.f32 %v541_v36, %v535_v38 }
 0x10a   : > { %v522_v43 = vadd.f32 %v799_v17, %v521_v40  ;;  %v543_v44 = vadd.f32 %v542_v41, %v536_v39 }
 0x10c   : > { %v523_v45 = vrot.slane %v522_v43, 4  ;;  %v544_v46 = vadd.f32 %v543_v44, %v537_v42 }
 0x10e   : > { %v524_v47 = vadd.f32 %v523_v45, %v522_v43  ;;  %v545_v48 = vrot.slane %v544_v46, 4 }
 0x110   : > { %v525_v49 = vrot.slane %v524_v47, 2  ;;  %v546_v50 = vadd.f32 %v545_v48, %v544_v46 }
 0x112   : > { %v526_v51 = vadd.f32 %v525_v49, %v524_v47  ;;  %v547_v52 = vrot.slane %v546_v50, 2 }
 0x114   : > { %v527_v53 = vrot.slane %v526_v51, 1  ;;  %v548_v54 = vadd.f32 %v547_v52, %v546_v50 }
 0x116   : > { %v528_v55 = vadd.f32 %v527_v53, %v526_v51  ;;  %v549_v56 = vrot.slane %v548_v54, 1 }
 0x118   : > { %v550_v57 = vadd.f32 %v549_v56, %v548_v54  ;;  %552 = vst [vmem:[%s262_s24] sm:$0xff] %v528_v55 }
 0x11a   : > { %553 = vst [vmem:[%s266_s27] sm:$0xff] %v550_v57 }
 0x11b PF: > { %s15_s17 = sadd.s32 1, %s874_s17   ;;  %s987_s15 = smov %s870_s16 }
 0x11c   : > { %p12_p6 = scmp.ge.s32.totalorder %s15_s17, 4   ;;  %s988_s16 = smov %s990_s18 }
 0x11e   :  { %14 = sbr.rel (!%p12_p6) target bundleno = 2 (0x2), region = 93 }

</bundles_post_ra>
